<compile_context>
chip_gen: v6e
topology: v6e:2x2x1
jax: 0.10.0
libtpu: 0.0.40
codegen_flags: <defaults>
</compile_context>

<pallas_src>
import math
import numpy as np
import jax
import jax.numpy as jnp
from jax.experimental import pallas as pl
from jax.experimental.pallas import tpu as pltpu


def _round_up(x, m):
    return (x + m - 1) // m * m


def conv_transpose1d_pallas(x, weight, *, stride=1, padding=0, dilation=1):
    """ConvTranspose1d (bias=False).

    x:      (N, C_in, L_in)   float32
    weight: (C_in, C_out, K)  float32 (PyTorch ConvTranspose1d layout)
    returns (N, C_out, L_out), L_out = (L_in-1)*stride - 2*padding + dilation*(K-1) + 1
    """
    N, C_in, L_in = map(int, x.shape)
    wc_in, C_out, K = map(int, weight.shape)
    assert wc_in == C_in
    s, p, d = int(stride), int(padding), int(dilation)
    L_out = (L_in - 1) * s - 2 * p + d * (K - 1) + 1
    assert L_out > 0

    # ---- static polyphase schedule (pure Python, baked into the kernel) ----
    # y[n, co, m*s + r] = sum_{k in taps(r)} sum_ci x[n, ci, m + c(k,r)] * w[ci, co, k]
    #   taps(r) = {k : (r + p - k*d) % s == 0},  c(k,r) = (r + p - k*d) // s
    # Out-of-range input positions are handled by zero-padding x once, so the
    # kernel body has no masks and no gathers.
    taps_by_residue, all_c = [], []
    for r in range(s):
        taps = []
        for k in range(K):
            t = r + p - k * d
            if t % s == 0:
                c = t // s
                taps.append((k, c))
                all_c.append(c)
        taps_by_residue.append(taps)
    c_min = min(all_c) if all_c else 0
    c_max = max(all_c) if all_c else 0
    PL = max(0, -c_min)                               # left zero-pad of x

    # ---- tiling -------------------------------------------------------------
    M_out = -(-L_out // s)                            # per-residue output length
    M_TILE = min(1024, _round_up(M_out, 128))         # lane-dense output tile
    n_m_tiles = -(-M_out // M_TILE)
    M_pad = n_m_tiles * M_TILE
    L_x_pad = _round_up(max(M_pad + c_max + PL, L_in + PL), 128)

    # Batch grouping: NB batches per grid step.  NB must divide N, keep blocks
    # comfortably inside scoped VMEM (16 MiB default on v5e), and leave >= 2
    # grid steps along the parallel batch axis whenever N >= 2 (v7x: 2 TCs).
    def _step_bytes(nb):
        in_blk = nb * C_in * L_x_pad * 4
        out_blk = nb * s * C_out * M_TILE * 4
        return 2 * (in_blk + out_blk)                 # double-buffered in + out
    NB = 1
    for cand in range(max(1, N // 2), 0, -1):
        if N % cand == 0 and _step_bytes(cand) <= 12 * 1024 * 1024:
            NB = cand
            break
    n_groups = N // NB

    w_bytes = K * C_out * C_in * 4
    vmem_need = _step_bytes(NB) + 2 * w_bytes + (1 << 20)
    vmem_limit = int(min(max(vmem_need, 32 * 1024 * 1024), 64 * 1024 * 1024))

    out_dtype = x.dtype

    # ---- kernel -------------------------------------------------------------
    def kernel(x_ref, w_ref, o_ref):
        # x_ref: (NB, C_in, L_x_pad)     zero-padded input, resident per batch group
        # w_ref: (K, C_out, C_in)        weights, resident across the whole grid
        # o_ref: (NB, s, C_out, M_TILE)  per-residue (deinterleaved), lane-dense
        if n_m_tiles > 1:
            m0 = pl.multiple_of(pl.program_id(1) * M_TILE, 128)
        else:
            m0 = 0                                    # fully static slice starts
        for n in range(NB):
            for r in range(s):
                taps = taps_by_residue[r]
                if not taps:
                    o_ref[n, r, :, :] = jnp.zeros((C_out, M_TILE), o_ref.dtype)
                    continue
                acc = None
                for (k, c) in taps:
                    xs = x_ref[n, :, pl.ds(m0 + (c + PL), M_TILE)]   # (C_in, M_TILE)
                    contrib = jnp.dot(w_ref[k], xs,
                                      preferred_element_type=jnp.float32)
                    acc = contrib if acc is None else acc + contrib
                o_ref[n, r, :, :] = acc.astype(o_ref.dtype)

    grid = (n_groups, n_m_tiles)
    in_specs = [
        pl.BlockSpec((NB, C_in, L_x_pad), lambda g, mt: (g, 0, 0)),
        # Constant across the grid and tiny; default double-buffering is
        # harmless here (use pl.Buffered(1) only if channels scale up a lot).
        pl.BlockSpec((K, C_out, C_in), lambda g, mt: (0, 0, 0)),
    ]
    out_specs = pl.BlockSpec((NB, s, C_out, M_TILE), lambda g, mt: (g, 0, 0, mt))

    @jax.jit
    def run(x, weight):
        # One small, input-sized pad handles every boundary case (so the
        # kernel needs no masks).  Cast x_pad / w_t to bf16 here for ~2x less
        # DMA if ~1e-2 relative error is acceptable; kept f32 for 1e-5 parity.
        x_pad = jnp.pad(x, ((0, 0), (0, 0), (PL, L_x_pad - L_in - PL)))
        w_t = jnp.transpose(weight, (2, 1, 0))        # (K, C_out, C_in)

        y_deint = pl.pallas_call(
            kernel,
            out_shape=jax.ShapeDtypeStruct((N, s, C_out, M_pad), out_dtype),
            grid=grid,
            in_specs=in_specs,
            out_specs=out_specs,
            compiler_params=pltpu.CompilerParams(
                dimension_semantics=("parallel", "parallel"),
                vmem_limit_bytes=vmem_limit,
            ),
        )(x_pad, w_t)

        # Interleave residues back to (N, C_out, L_out).  s == 1: pure slice.
        # s > 1: ONE output-sized pass (replaces the old crop, not in addition).
        if s == 1:
            y = y_deint[:, 0, :, :L_out]
        else:
            y = jnp.transpose(y_deint, (0, 2, 3, 1)).reshape(N, C_out, M_pad * s)
            y = y[:, :, :L_out]
        return y

    return run(x, weight)
    # TODO(synk): for very long inputs (NB*C_in*L_in*4 approaching VMEM) the
    # full-length resident input block should become halo'd L tiles via manual
    # make_async_copy; unnecessary at benchmark sizes.


def _reference(x, weight, stride, padding, dilation):
    """Brute-force NumPy reference matching torch.nn.ConvTranspose1d (bias=False)."""
    x = np.asarray(x); w = np.asarray(weight)
    N, C_in, L_in = x.shape
    _, C_out, K = w.shape
    L_out = (L_in - 1) * stride - 2 * padding + dilation * (K - 1) + 1
    y = np.zeros((N, C_out, L_out), dtype=np.float32)
    for i in range(L_in):
        for k in range(K):
            l = i * stride + k * dilation - padding
            if 0 <= l < L_out:
                y[:, :, l] += np.einsum("nc,cd->nd", x[:, :, i], w[:, :, k])
    return y


if __name__ == "__main__":
    # Module config (bias=False, as in RefModel default), small shapes.
    in_channels, out_channels, kernel_size = 4, 8, 3
    batch, L_in = 2, 16

    key = jax.random.PRNGKey(0)
    kx, kw = jax.random.split(key)
    x = jax.random.normal(kx, (batch, in_channels, L_in), dtype=jnp.float32)
    # PyTorch ConvTranspose1d weight shape: (in_channels, out_channels, K)
    fan_in = in_channels * kernel_size
    bound = 1.0 / math.sqrt(fan_in)
    weight = jax.random.uniform(
        kw, (in_channels, out_channels, kernel_size),
        minval=-bound, maxval=bound, dtype=jnp.float32)

    configs = [
        dict(stride=2, padding=1, dilation=2),   # dilated + strided (RefModel-style)
        dict(stride=1, padding=0, dilation=3),   # stride-1 path (single residue)
        dict(stride=2, padding=0, dilation=1),   # taps split across both residues
    ]
    for cfg in configs:
        y = conv_transpose1d_pallas(x, weight, **cfg)
        y = jax.block_until_ready(y)
        y_ref = _reference(x, weight, cfg["stride"], cfg["padding"], cfg["dilation"])
        assert y.shape == y_ref.shape, (y.shape, y_ref.shape, cfg)
        np.testing.assert_allclose(np.asarray(y), y_ref, rtol=1e-5, atol=1e-5)

    print("KERNEL_OK")
</pallas_src>

<mosaic_0001>
module attributes {stable_mosaic.version = 11 : i64} {
  func.func @kernel(%arg0: i32, %arg1: i32, %arg2: memref<1x4x256xf32, #tpu.memory_space<vmem>>, %arg3: memref<3x8x4xf32, #tpu.memory_space<vmem>>, %arg4: memref<1x2x8x128xf32, #tpu.memory_space<vmem>>) attributes {dimension_semantics = [#tpu.dimension_semantics<parallel>, #tpu.dimension_semantics<parallel>], iteration_bounds = array<i64: 2, 1>, scalar_prefetch = 0 : i64, scratch_operands = 0 : i64, tpu.core_type = #tpu.core_type<tc>, window_params = [{transform_indices = @transform_0, window_bounds = array<i64: 1, 4, 256>}, {pipeline_mode = #tpu.pipeline_mode<synchronous>, transform_indices = @transform_1, window_bounds = array<i64: 3, 8, 4>}, {transform_indices = @transform_2, window_bounds = array<i64: 1, 2, 8, 128>}]} {
    %cst = arith.constant 0.000000e+00 : f32
    %0 = vector.broadcast %cst : f32 to vector<8x128xf32>
    %c0 = arith.constant 0 : index
    %c0_0 = arith.constant 0 : index
    %c0_1 = arith.constant 0 : index
    %c0_2 = arith.constant 0 : index
    %1 = vector.load %arg4[%c0, %c0_0, %c0_1, %c0_2] : memref<1x2x8x128xf32, #tpu.memory_space<vmem>>, vector<1x1x8x128xf32>
    %2 = vector.shape_cast %1 : vector<1x1x8x128xf32> to vector<8x128xf32>
    %3 = vector.shape_cast %0 : vector<8x128xf32> to vector<1x1x8x128xf32>
    tpu.vector_store %arg4[%c0, %c0_0, %c0_1, %c0_2], %3 {strides = array<i32>} : memref<1x2x8x128xf32, #tpu.memory_space<vmem>>, vector<1x1x8x128xf32>,
    %c0_3 = arith.constant 0 : index
    %c0_4 = arith.constant 0 : index
    %c2 = arith.constant 2 : index
    %4 = vector.load %arg2[%c0_3, %c0_4, %c2] : memref<1x4x256xf32, #tpu.memory_space<vmem>>, vector<1x4x128xf32>
    %5 = vector.shape_cast %4 : vector<1x4x128xf32> to vector<4x128xf32>
    %c0_5 = arith.constant 0 : index
    %c0_6 = arith.constant 0 : index
    %c0_7 = arith.constant 0 : index
    %6 = vector.load %arg3[%c0_5, %c0_6, %c0_7] : memref<3x8x4xf32, #tpu.memory_space<vmem>>, vector<1x8x4xf32>
    %7 = vector.shape_cast %6 : vector<1x8x4xf32> to vector<8x4xf32>
    %cst_8 = arith.constant dense<0.000000e+00> : vector<8x128xf32>
    %8 = tpu.matmul %7, %5, %cst_8 {dimension_numbers = #tpu.dot_dimension_numbers<[1], [0], [0], [1], [0, 0, 1, 1], [], []>} : vector<8x4xf32>, vector<4x128xf32>, vector<8x128xf32> -> vector<8x128xf32>
    %c0_9 = arith.constant 0 : index
    %c0_10 = arith.constant 0 : index
    %c1 = arith.constant 1 : index
    %9 = vector.load %arg2[%c0_9, %c0_10, %c1] : memref<1x4x256xf32, #tpu.memory_space<vmem>>, vector<1x4x128xf32>
    %10 = vector.shape_cast %9 : vector<1x4x128xf32> to vector<4x128xf32>
    %c1_11 = arith.constant 1 : index
    %c0_12 = arith.constant 0 : index
    %c0_13 = arith.constant 0 : index
    %11 = vector.load %arg3[%c1_11, %c0_12, %c0_13] : memref<3x8x4xf32, #tpu.memory_space<vmem>>, vector<1x8x4xf32>
    %12 = vector.shape_cast %11 : vector<1x8x4xf32> to vector<8x4xf32>
    %cst_14 = arith.constant dense<0.000000e+00> : vector<8x128xf32>
    %13 = tpu.matmul %12, %10, %cst_14 {dimension_numbers = #tpu.dot_dimension_numbers<[1], [0], [0], [1], [0, 0, 1, 1], [], []>} : vector<8x4xf32>, vector<4x128xf32>, vector<8x128xf32> -> vector<8x128xf32>
    %14 = arith.addf %8, %13 : vector<8x128xf32>
    %c0_15 = arith.constant 0 : index
    %c0_16 = arith.constant 0 : index
    %c0_17 = arith.constant 0 : index
    %15 = vector.load %arg2[%c0_15, %c0_16, %c0_17] : memref<1x4x256xf32, #tpu.memory_space<vmem>>, vector<1x4x128xf32>
    %16 = vector.shape_cast %15 : vector<1x4x128xf32> to vector<4x128xf32>
    %c2_18 = arith.constant 2 : index
    %c0_19 = arith.constant 0 : index
    %c0_20 = arith.constant 0 : index
    %17 = vector.load %arg3[%c2_18, %c0_19, %c0_20] : memref<3x8x4xf32, #tpu.memory_space<vmem>>, vector<1x8x4xf32>
    %18 = vector.shape_cast %17 : vector<1x8x4xf32> to vector<8x4xf32>
    %cst_21 = arith.constant dense<0.000000e+00> : vector<8x128xf32>
    %19 = tpu.matmul %18, %16, %cst_21 {dimension_numbers = #tpu.dot_dimension_numbers<[1], [0], [0], [1], [0, 0, 1, 1], [], []>} : vector<8x4xf32>, vector<4x128xf32>, vector<8x128xf32> -> vector<8x128xf32>
    %20 = arith.addf %14, %19 : vector<8x128xf32>
    %c0_22 = arith.constant 0 : index
    %c1_23 = arith.constant 1 : index
    %c0_24 = arith.constant 0 : index
    %c0_25 = arith.constant 0 : index
    %21 = vector.load %arg4[%c0_22, %c1_23, %c0_24, %c0_25] : memref<1x2x8x128xf32, #tpu.memory_space<vmem>>, vector<1x1x8x128xf32>
    %22 = vector.shape_cast %21 : vector<1x1x8x128xf32> to vector<8x128xf32>
    %23 = vector.shape_cast %20 : vector<8x128xf32> to vector<1x1x8x128xf32>
    tpu.vector_store %arg4[%c0_22, %c1_23, %c0_24, %c0_25], %23 {strides = array<i32>} : memref<1x2x8x128xf32, #tpu.memory_space<vmem>>, vector<1x1x8x128xf32>,
    return
  }
  func.func @transform_0(%arg0: i32, %arg1: i32) -> (i32, i32, i32) {
    %c0_i32 = arith.constant 0 : i32
    %c0_i32_0 = arith.constant 0 : i32
    %c0_i32_1 = arith.constant 0 : i32
    return %arg0, %c0_i32, %c0_i32_0 : i32, i32, i32
  }
  func.func @transform_1(%arg0: i32, %arg1: i32) -> (i32, i32, i32) {
    %c0_i32 = arith.constant 0 : i32
    %c0_i32_0 = arith.constant 0 : i32
    %c0_i32_1 = arith.constant 0 : i32
    %c0_i32_2 = arith.constant 0 : i32
    return %c0_i32, %c0_i32_0, %c0_i32_1 : i32, i32, i32
  }
  func.func @transform_2(%arg0: i32, %arg1: i32) -> (i32, i32, i32, i32) {
    %c0_i32 = arith.constant 0 : i32
    %c0_i32_0 = arith.constant 0 : i32
    %c0_i32_1 = arith.constant 0 : i32
    return %arg0, %c0_i32, %c0_i32_0, %arg1 : i32, i32, i32, i32
  }
}

</mosaic_0001>

<bundles_post_ra>
// kernel: run.1
= control target key start
LH: loop header
LB: loop body
LE: loop exit
PB: predicated region body
PF: predicated region fallthrough
CT: control target
= control target key end

     0   :  { %s609_s9 = smov 0   ;;  %s611_s10 = smov 0   ;;  %s658_s0 = inlined_call_operand.vmem [shape: f32[2,4,256], index: 0, kind: input, shape index: {}]   ;;  %s659_s1 = inlined_call_operand.vmem [shape: f32[3,8,4], index: 1, kind: input, shape index: {}]   ;;  %s660_s2 = inlined_call_operand.vmem [shape: f32[2,2,8,128], index: 2, kind: output, shape index: {}]  }
   0x1   :  { %s613_s11 = smov 0  }
   0x2 LB: > { %s24_s12 = sadd.s32 1, %s584_s10  ;;  %p498_p0 = scmp.ge.s32.totalorder %s588_s11, 1  ;;  %s588_s11 = sphi %s613_s11, %s12_s11   ;;  %s584_s10 = sphi %s611_s10, %s662_s10   ;;  %s580_s9 = sphi %s609_s9, %s661_s9  }
   0x3   : > { %p26_p1 = scmp.ge.s32.totalorder %s24_s12, 2  ;;  %p126_p2 = scmp.lt.s32.totalorder %s588_s11, 3 }
   0x5   : > { %s664_s12 = smov (%p26_p1, %s24_s12), 0  ;;  %p127_p3 = pnand %p498_p0, %p126_p2 }
   0x6   : > { %p151_p4 = scmp.lt.s32.totalorder (!%p127_p3), %s580_s9, 1  ;;  %s592_s17 = smov (!%p127_p3), 126  }
   0x7   : > { %130 = sbr.rel (%p127_p3) target bundleno = 337 (0x151), region = 28  ;;  %s593_s18 = smov (!%p127_p3), 127  }
   0xc   : > { %v590_v0 = vmov 0.0   ;;  %s666_s9 = smov (!%p151_p4, %s580_s9), 1  ;;  %vm591_vm0 = vmmov 0   ;;  %vm175_vm1 = vcmask 1039360   ;;  %vm258_vm2 = vcmask 1031168   ;;  %v503_v7 = vld [vmem:[%s659_s1 + $0x8] sm:$0xff] }
   0xd   : > { %522 = vmatprep.subr.mxu0 %v590_v0  ;;  %527 = vmatprep.subr.mxu1 %v590_v0  ;;  %s514_s13 = sshll.u32 %s666_s9, 3  ;;  %vm181_vm3 = vcmask 1043456   ;;  %vm177_vm4 = vcmask 31744   ;;  %v166_v11 = vld [vmem:[%s659_s1] sm:$0xff]  ;;  %v508_v12 = vld [vmem:[%s659_s1 + $0x10] sm:$0xff]  ;;  %s515_s25 = sshll.u32 %s666_s9, 4 }
   0xe   : > { %524 = vmatprep.mubr.msk.f32.mxu0 %vm591_vm0, %v590_v0  ;;  %529 = vmatprep.mubr.msk.f32.mxu1 %vm591_vm0, %v590_v0  ;;  %s155_s16 = scalar_lea.vmem %s658_s0, %s514_s13  ;;  %s163_s28 = scalar_lea.vmem %s660_s2, %s515_s25 }
   0xf   : > { %v165_v1 = vld [vmem:[%s155_s16] sm:$0xff]  ;;  %164 = vst [vmem:[%s163_s28] sm:$0xff] %v590_v0 }
  0x10   : > { %254 = vrot.lane.b32.xlu1 %v165_v1, %s592_s17  ;;  %171 = vrot.lane.b32.xlu0 %v165_v1, %s593_s18  ;;  %v170_v2 = vcombine.high %v165_v1, %v165_v1  ;;  %v335_v8 = vld [vmem:[%s155_s16] sm:$0xf] }
  0x14   : > { %256 = vrot.lane.b32.xlu1 %v170_v2, %s592_s17  ;;  %173 = vrot.lane.b32.xlu0 %v170_v2, %s593_s18 }
  0x82   : > { %v255_v3 = vpop.permute.xlu1 %254  ;;  %v172_v4 = vpop.permute.xlu0 %171 }
  0x86   : > { %v257_v5 = vpop.permute.xlu1 %256  ;;  %v174_v6 = vpop.permute.xlu0 %173 }
  0x87   : > { %v176_v9 = vsel %vm175_vm1, %v172_v4, %v174_v6  ;;  %v259_v10 = vsel %vm258_vm2, %v255_v3, %v257_v5 }
  0x88   : > { %523 = vmatpush3.msk.msra.mxu0 %vm181_vm3, %v176_v9  ;;  %528 = vmatpush3.msk.msra.mxu1 %vm181_vm3, %v259_v10 }
  0x89   : > { %525 = vmatmul.mubr.msk.f32.vlgmr.msra.gmra.mxu0 %vm177_vm4, %v503_v7  ;;  %532 = vmatprep.subr.mxu0 %v590_v0 }
  0x8a   : > { %530 = vmatmul.mubr.msk.f32.vlgmr.msra.gmra.mxu1 %vm177_vm4, %v166_v11  ;;  %533 = vmatpush3.msk.msra.mxu0 %vm181_vm3, %v335_v8 }
  0x8b   : > { %534 = vmatprep.mubr.msk.f32.mxu0 %vm591_vm0, %v590_v0 }
  0x8d   : > { %535 = vmatmul.mubr.msk.f32.vlgmr.msra.gmra.mxu0 %vm177_vm4, %v508_v12 }
 0x149   : > { %v250_v13 = vpop.f32.mrf.mxu0 }
 0x14a   : > { %v331_v14 = vpop.f32.mrf.mxu1 }
 0x14b   : > { %v526_v15 = vpop.f32.mrf.mxu0  ;;  %v332_v16 = vadd.f32 %v331_v14, %v250_v13 }
 0x14c   : > { %v531_v17 = vpop.f32.mrf.mxu1 }
 0x14d   : > { %v410_v18 = vpop.f32.mrf.mxu0 }
 0x14e   : > { %v414_v19 = vadd.f32 %v410_v18, %v332_v16 }
 0x14f   : > { %v536_v20 = vpop.f32.mrf.mxu0 }
 0x150   : > { %511 = vst [vmem:[%s163_s28 + $0x8] sm:$0xff] %v414_v19 }
 0x151 PF: > { %s12_s11 = sadd.s32 1, %s588_s11   ;;  %s661_s9 = smov %s584_s10 }
 0x152   : > { %p9_p5 = scmp.ge.s32.totalorder %s12_s11, 4   ;;  %s662_s10 = smov %s664_s12 }
 0x154   :  { %11 = sbr.rel (!%p9_p5) target bundleno = 2 (0x2), region = 61 }

</bundles_post_ra>
